<compile_context>
chip_gen: v5e
topology: v5e:2x2
jax: 0.10.0
libtpu: 0.0.40
codegen_flags: <defaults>
</compile_context>

<pallas_src>
import functools

import jax
import jax.numpy as jnp
from jax.experimental import pallas as pl
from jax.experimental.pallas import tpu as pltpu


def _round_up(x, m):
    return ((x + m - 1) // m) * m


def _pad2d(a, rows, cols):
    return jnp.pad(a, ((0, rows - a.shape[0]), (0, cols - a.shape[1])))


def _mlp_kernel(h_ref, w1_ref, b1_ref, w2_hbm, b2_ref, w3_hbm, b3_ref,
                ph_ref, px1_ref, px2_ref,
                x2_out_ref, y_out_ref,
                w2_vmem, w3_vmem, sem,
                *, yeta1, yeta2, yeta3):
    """Fused 3-layer MLP with in-kernel prompt blending.

    yeta1/yeta2/yeta3 are compile-time constants (0.0 => no blend for that
    layer, i.e. levels 'c1'/'c2').  Blending, bias add and ReLU are f32 VPU
    work; MXU operands are the (bf16 or f32) weight dtype with f32 accumulate.
    w2/w3 arrive as HBM refs; their copies into VMEM scratch are started at
    kernel entry and waited on just before the dot that needs them, hiding
    the DMA behind layer-1 / layer-2 compute.
    """
    cp2 = pltpu.make_async_copy(w2_hbm, w2_vmem, sem.at[0])
    cp3 = pltpu.make_async_copy(w3_hbm, w3_vmem, sem.at[1])
    cp2.start()
    cp3.start()

    cd = w1_ref.dtype  # MXU operand dtype

    # ---- layer 1: relu((blend(h)) @ W1 + b1) -------------------------------
    h = h_ref[...]
    if yeta1:
        h = (1.0 - yeta1) * h + yeta1 * ph_ref[...]
    x1 = jnp.dot(h.astype(cd), w1_ref[...],
                 preferred_element_type=jnp.float32) + b1_ref[...]
    x1 = jnp.maximum(x1, 0.0)
    if yeta2:
        x1 = (1.0 - yeta2) * x1 + yeta2 * px1_ref[...]

    # ---- layer 2: x2 = blend(x1) @ W2 + b2 (module returns this x2) --------
    cp2.wait()
    x2 = jnp.dot(x1.astype(cd), w2_vmem[...],
                 preferred_element_type=jnp.float32) + b2_ref[...]
    x2_out_ref[...] = x2

    x2b = x2
    if yeta3:
        x2b = (1.0 - yeta3) * x2 + yeta3 * px2_ref[...]

    # ---- layer 3: y = blend(x2) @ W3 + b3 ----------------------------------
    cp3.wait()
    y = jnp.dot(x2b.astype(cd), w3_vmem[...],
                preferred_element_type=jnp.float32) + b3_ref[...]
    y_out_ref[...] = y


class ReTrainDNNPromptV2:
    """JAX/Pallas equivalent of the PyTorch Re_Train_DNN_Prompt_v2 module.

    Pads and casts parameters exactly once at construction; __call__ is a
    jitted (pad input -> one gridless pallas_call -> slice outputs) pipeline.
    """

    def __init__(self, params, *, level="c1", yeta=0.1,
                 compute_dtype=jnp.bfloat16):
        assert level in ("c1", "c2", "c3")
        w1, b1, w2, b2, w3, b3, ph, px1, px2 = params
        self.d_in, self.h0 = w1.shape
        self.h1 = w2.shape[1]
        self.n_cls = w3.shape[1]
        self.compute_dtype = compute_dtype

        # lane/sublane-friendly padded dims
        self.dp = _round_up(self.d_in, 128)
        self.h0p = _round_up(self.h0, 128)
        self.h1p = _round_up(self.h1, 128)
        self.cp = _round_up(self.n_cls, 128)

        # one-time pad + cast; weights stored persistently in compute_dtype
        self.w1p = _pad2d(w1, self.dp, self.h0p).astype(compute_dtype)
        self.w2p = _pad2d(w2, self.h0p, self.h1p).astype(compute_dtype)
        self.w3p = _pad2d(w3, self.h1p, self.cp).astype(compute_dtype)
        self.b1p = _pad2d(b1, 1, self.h0p).astype(jnp.float32)
        self.b2p = _pad2d(b2, 1, self.h1p).astype(jnp.float32)
        self.b3p = _pad2d(b3, 1, self.cp).astype(jnp.float32)
        self.php = _pad2d(ph, 1, self.dp).astype(jnp.float32)
        self.px1p = _pad2d(px1, 1, self.h0p).astype(jnp.float32)
        self.px2p = _pad2d(px2, 1, self.h1p).astype(jnp.float32)

        y1 = float(yeta) if level in ("c2", "c3") else 0.0
        y2 = float(yeta) if level in ("c2", "c3") else 0.0
        y3 = float(yeta) if level == "c3" else 0.0
        self._kernel = functools.partial(_mlp_kernel, yeta1=y1, yeta2=y2,
                                         yeta3=y3)
        self._fwd = jax.jit(self._forward)

    def _forward(self, h):
        B, d_in = h.shape
        bp = _round_up(max(B, 8), 8)
        hp = jnp.pad(h.astype(jnp.float32),
                     ((0, bp - B), (0, self.dp - d_in)))

        w_item = jnp.dtype(self.compute_dtype).itemsize
        flops = 2 * bp * (self.dp * self.h0p + self.h0p * self.h1p
                          + self.h1p * self.cp)
        bytes_accessed = (
            bp * self.dp * 4
            + (self.dp * self.h0p + self.h0p * self.h1p
               + self.h1p * self.cp) * w_item
            + (self.h0p + self.h1p + self.cp) * 4        # biases
            + (self.dp + self.h0p + self.h1p) * 4        # prompts
            + bp * (self.h1p + self.cp) * 4)             # outputs

        vmem = pl.BlockSpec(memory_space=pltpu.MemorySpace.VMEM)
        hbm = pl.BlockSpec(memory_space=pl.ANY)

        x2p, yp = pl.pallas_call(
            self._kernel,
            out_shape=(
                jax.ShapeDtypeStruct((bp, self.h1p), jnp.float32),  # x2
                jax.ShapeDtypeStruct((bp, self.cp), jnp.float32),   # y
            ),
            in_specs=[vmem, vmem, vmem, hbm, vmem, hbm, vmem,
                      vmem, vmem, vmem],
            out_specs=(vmem, vmem),
            scratch_shapes=[
                pltpu.VMEM((self.h0p, self.h1p), self.compute_dtype),
                pltpu.VMEM((self.h1p, self.cp), self.compute_dtype),
                pltpu.SemaphoreType.DMA((2,)),
            ],
            cost_estimate=pl.CostEstimate(flops=flops, transcendentals=0,
                                          bytes_accessed=bytes_accessed),
        )(hp, self.w1p, self.b1p, self.w2p, self.b2p, self.w3p, self.b3p,
          self.php, self.px1p, self.px2p)

        return x2p[:B, :self.h1], yp[:B, :self.n_cls]

    def __call__(self, h):
        return self._fwd(h)


def init_params(key, input_dim, hidden_dims, n_classes):
    """Deterministic parameter init (PyTorch nn.Linear-like uniform ranges).

    Weights are stored already transposed: (in_features, out_features).
    Prompt embeddings are zero in the original module; small deterministic
    values are used here so the blending paths are actually exercised.
    """
    ks = jax.random.split(key, 9)

    def linear(kw, kb, fan_in, fan_out):
        bound = 1.0 / jnp.sqrt(jnp.float32(fan_in))
        w = jax.random.uniform(kw, (fan_in, fan_out), jnp.float32, -bound, bound)
        b = jax.random.uniform(kb, (1, fan_out), jnp.float32, -bound, bound)
        return w, b

    w1, b1 = linear(ks[0], ks[1], input_dim, hidden_dims[0])
    w2, b2 = linear(ks[2], ks[3], hidden_dims[0], hidden_dims[1])
    w3, b3 = linear(ks[4], ks[5], hidden_dims[1], n_classes)

    ph = 0.01 * jax.random.normal(ks[6], (1, input_dim), jnp.float32)
    px1 = 0.01 * jax.random.normal(ks[7], (1, hidden_dims[0]), jnp.float32)
    px2 = 0.01 * jax.random.normal(ks[8], (1, hidden_dims[1]), jnp.float32)

    return (w1, b1, w2, b2, w3, b3, ph, px1, px2)


def reference_forward(h, params, *, yeta=0.1, level="c3"):
    """Pure-JAX reference matching the PyTorch forward semantics (true f32)."""
    w1, b1, w2, b2, w3, b3, ph, px1, px2 = params
    dot = functools.partial(jnp.dot, precision=jax.lax.Precision.HIGHEST)
    if level == "c1":
        x1 = jnp.maximum(dot(h, w1) + b1, 0.0)
        x2 = dot(x1, w2) + b2
        y = dot(x2, w3) + b3
    elif level == "c2":
        x1 = jnp.maximum(dot((1 - yeta) * h + yeta * ph, w1) + b1, 0.0)
        x2 = dot((1 - yeta) * x1 + yeta * px1, w2) + b2
        y = dot(x2, w3) + b3
    else:  # c3
        x1 = jnp.maximum(dot((1 - yeta) * h + yeta * ph, w1) + b1, 0.0)
        x2 = dot((1 - yeta) * x1 + yeta * px1, w2) + b2
        y = dot((1 - yeta) * x2 + yeta * px2, w3) + b3
    return x2, y


if __name__ == "__main__":
    # Shapes implied by the module: input_dim=84, hidden_dims=[84, 512]
    # (prompt shapes (1,84) and (1,512)), small n_classes.
    B = 8
    INPUT_DIM = 84
    HIDDEN_DIMS = (84, 512)
    N_CLASSES = 10
    YETA = 0.1

    key = jax.random.PRNGKey(0)
    k_h, k_p = jax.random.split(key)

    h = jax.random.normal(k_h, (B, INPUT_DIM), jnp.float32)
    params = init_params(k_p, INPUT_DIM, HIDDEN_DIMS, N_CLASSES)

    # fp32 MXU path -- check every blending level against the reference.
    for level in ("c1", "c2", "c3"):
        model = ReTrainDNNPromptV2(params, level=level, yeta=YETA,
                                   compute_dtype=jnp.float32)
        x2, y = model(h)
        x2 = jax.block_until_ready(x2)
        y = jax.block_until_ready(y)
        assert x2.shape == (B, HIDDEN_DIMS[1]) and y.shape == (B, N_CLASSES)
        x2_ref, y_ref = reference_forward(h, params, yeta=YETA, level=level)
        assert jnp.allclose(x2, x2_ref, atol=5e-3, rtol=5e-3), f"x2 mismatch ({level})"
        assert jnp.allclose(y, y_ref, atol=5e-3, rtol=5e-3), f"y mismatch ({level})"

    # bf16 weight storage + bf16 MXU operands (default / recommended mode):
    # f32 activation blending + f32 accumulation, relaxed tolerance for the
    # bf16 operand rounding.
    model_bf16 = ReTrainDNNPromptV2(params, level="c3", yeta=YETA,
                                    compute_dtype=jnp.bfloat16)
    x2b, yb = model_bf16(h)
    x2b = jax.block_until_ready(x2b)
    yb = jax.block_until_ready(yb)
    x2_ref, y_ref = reference_forward(h, params, yeta=YETA, level="c3")
    assert jnp.allclose(x2b, x2_ref, atol=5e-2, rtol=5e-2), "x2 mismatch (bf16)"
    assert jnp.allclose(yb, y_ref, atol=5e-2, rtol=5e-2), "y mismatch (bf16)"

    print("KERNEL_OK")
</pallas_src>

<mosaic_0001>
module attributes {stable_mosaic.version = 11 : i64} {
  func.func @_mlp_kernel(%arg0: memref<8x128xf32, #tpu.memory_space<vmem>>, %arg1: memref<128x128xf32, #tpu.memory_space<vmem>>, %arg2: memref<1x128xf32, #tpu.memory_space<vmem>>, %arg3: memref<128x512xf32, #tpu.memory_space<any>>, %arg4: memref<1x512xf32, #tpu.memory_space<vmem>>, %arg5: memref<512x128xf32, #tpu.memory_space<any>>, %arg6: memref<1x128xf32, #tpu.memory_space<vmem>>, %arg7: memref<1x128xf32, #tpu.memory_space<vmem>>, %arg8: memref<1x128xf32, #tpu.memory_space<vmem>>, %arg9: memref<1x512xf32, #tpu.memory_space<vmem>>, %arg10: memref<8x512xf32, #tpu.memory_space<vmem>>, %arg11: memref<8x128xf32, #tpu.memory_space<vmem>>, %arg12: memref<128x512xf32, #tpu.memory_space<vmem>>, %arg13: memref<512x128xf32, #tpu.memory_space<vmem>>, %arg14: memref<2x!tpu.dma_semaphore, #tpu.memory_space<semaphore_mem>>) attributes {dimension_semantics = [], scalar_prefetch = 0 : i64, scratch_operands = 3 : i64, tpu.core_type = #tpu.core_type<tc>} {
    %c0_i32 = arith.constant 0 : i32
    %0 = tpu.memref_slice %arg14[%c0_i32] : memref<2x!tpu.dma_semaphore, #tpu.memory_space<semaphore_mem>> -> memref<1x!tpu.dma_semaphore, #tpu.memory_space<semaphore_mem>>
    %1 = tpu.memref_squeeze %0 : memref<1x!tpu.dma_semaphore, #tpu.memory_space<semaphore_mem>> -> memref<!tpu.dma_semaphore, #tpu.memory_space<semaphore_mem>>
    tpu.enqueue_dma source(%arg3 : memref<128x512xf32, #tpu.memory_space<any>>) target(%arg12 : memref<128x512xf32, #tpu.memory_space<vmem>>) target_semaphore(%1 : memref<!tpu.dma_semaphore, #tpu.memory_space<semaphore_mem>>)
    %c1_i32 = arith.constant 1 : i32
    %2 = tpu.memref_slice %arg14[%c1_i32] : memref<2x!tpu.dma_semaphore, #tpu.memory_space<semaphore_mem>> -> memref<1x!tpu.dma_semaphore, #tpu.memory_space<semaphore_mem>>
    %3 = tpu.memref_squeeze %2 : memref<1x!tpu.dma_semaphore, #tpu.memory_space<semaphore_mem>> -> memref<!tpu.dma_semaphore, #tpu.memory_space<semaphore_mem>>
    tpu.enqueue_dma source(%arg5 : memref<512x128xf32, #tpu.memory_space<any>>) target(%arg13 : memref<512x128xf32, #tpu.memory_space<vmem>>) target_semaphore(%3 : memref<!tpu.dma_semaphore, #tpu.memory_space<semaphore_mem>>)
    %c0 = arith.constant 0 : index
    %c0_0 = arith.constant 0 : index
    %4 = vector.load %arg0[%c0, %c0_0] : memref<8x128xf32, #tpu.memory_space<vmem>>, vector<8x128xf32>
    %c0_1 = arith.constant 0 : index
    %c0_2 = arith.constant 0 : index
    %5 = vector.load %arg1[%c0_1, %c0_2] : memref<128x128xf32, #tpu.memory_space<vmem>>, vector<128x128xf32>
    %cst = arith.constant dense<0.000000e+00> : vector<8x128xf32>
    %6 = tpu.matmul %4, %5, %cst {dimension_numbers = #tpu.dot_dimension_numbers<[1], [0], [0], [1], [0, 0, 1, 1], [], []>} : vector<8x128xf32>, vector<128x128xf32>, vector<8x128xf32> -> vector<8x128xf32>
    %c0_3 = arith.constant 0 : index
    %c0_4 = arith.constant 0 : index
    %7 = vector.load %arg2[%c0_3, %c0_4] : memref<1x128xf32, #tpu.memory_space<vmem>>, vector<1x128xf32>
    %8 = vector.broadcast %7 : vector<1x128xf32> to vector<8x128xf32>
    %9 = arith.addf %6, %8 : vector<8x128xf32>
    %cst_5 = arith.constant 0.000000e+00 : f32
    %10 = vector.broadcast %cst_5 : f32 to vector<8x128xf32>
    %11 = arith.maximumf %9, %10 : vector<8x128xf32>
    %c0_i32_6 = arith.constant 0 : i32
    %12 = tpu.memref_slice %arg14[%c0_i32_6] : memref<2x!tpu.dma_semaphore, #tpu.memory_space<semaphore_mem>> -> memref<1x!tpu.dma_semaphore, #tpu.memory_space<semaphore_mem>>
    %13 = tpu.memref_squeeze %12 : memref<1x!tpu.dma_semaphore, #tpu.memory_space<semaphore_mem>> -> memref<!tpu.dma_semaphore, #tpu.memory_space<semaphore_mem>>
    tpu.wait_dma2 semaphore(%13 : memref<!tpu.dma_semaphore, #tpu.memory_space<semaphore_mem>>) src(%arg3 : memref<128x512xf32, #tpu.memory_space<any>>) dst(%arg12 : memref<128x512xf32, #tpu.memory_space<vmem>>)
    %c0_7 = arith.constant 0 : index
    %c0_8 = arith.constant 0 : index
    %14 = vector.load %arg12[%c0_7, %c0_8] : memref<128x512xf32, #tpu.memory_space<vmem>>, vector<128x512xf32>
    %cst_9 = arith.constant dense<0.000000e+00> : vector<8x512xf32>
    %15 = tpu.matmul %11, %14, %cst_9 {dimension_numbers = #tpu.dot_dimension_numbers<[1], [0], [0], [1], [0, 0, 1, 1], [], []>} : vector<8x128xf32>, vector<128x512xf32>, vector<8x512xf32> -> vector<8x512xf32>
    %c0_10 = arith.constant 0 : index
    %c0_11 = arith.constant 0 : index
    %16 = vector.load %arg4[%c0_10, %c0_11] : memref<1x512xf32, #tpu.memory_space<vmem>>, vector<1x512xf32>
    %17 = vector.broadcast %16 : vector<1x512xf32> to vector<8x512xf32>
    %18 = arith.addf %15, %17 : vector<8x512xf32>
    %c0_12 = arith.constant 0 : index
    %c0_13 = arith.constant 0 : index
    %19 = vector.load %arg10[%c0_12, %c0_13] : memref<8x512xf32, #tpu.memory_space<vmem>>, vector<8x512xf32>
    tpu.vector_store %arg10[%c0_12, %c0_13], %18 {strides = array<i32>} : memref<8x512xf32, #tpu.memory_space<vmem>>, vector<8x512xf32>,
    %c1_i32_14 = arith.constant 1 : i32
    %20 = tpu.memref_slice %arg14[%c1_i32_14] : memref<2x!tpu.dma_semaphore, #tpu.memory_space<semaphore_mem>> -> memref<1x!tpu.dma_semaphore, #tpu.memory_space<semaphore_mem>>
    %21 = tpu.memref_squeeze %20 : memref<1x!tpu.dma_semaphore, #tpu.memory_space<semaphore_mem>> -> memref<!tpu.dma_semaphore, #tpu.memory_space<semaphore_mem>>
    tpu.wait_dma2 semaphore(%21 : memref<!tpu.dma_semaphore, #tpu.memory_space<semaphore_mem>>) src(%arg5 : memref<512x128xf32, #tpu.memory_space<any>>) dst(%arg13 : memref<512x128xf32, #tpu.memory_space<vmem>>)
    %c0_15 = arith.constant 0 : index
    %c0_16 = arith.constant 0 : index
    %22 = vector.load %arg13[%c0_15, %c0_16] : memref<512x128xf32, #tpu.memory_space<vmem>>, vector<512x128xf32>
    %cst_17 = arith.constant dense<0.000000e+00> : vector<8x128xf32>
    %23 = tpu.matmul %18, %22, %cst_17 {dimension_numbers = #tpu.dot_dimension_numbers<[1], [0], [0], [1], [0, 0, 1, 1], [], []>} : vector<8x512xf32>, vector<512x128xf32>, vector<8x128xf32> -> vector<8x128xf32>
    %c0_18 = arith.constant 0 : index
    %c0_19 = arith.constant 0 : index
    %24 = vector.load %arg6[%c0_18, %c0_19] : memref<1x128xf32, #tpu.memory_space<vmem>>, vector<1x128xf32>
    %25 = vector.broadcast %24 : vector<1x128xf32> to vector<8x128xf32>
    %26 = arith.addf %23, %25 : vector<8x128xf32>
    %c0_20 = arith.constant 0 : index
    %c0_21 = arith.constant 0 : index
    %27 = vector.load %arg11[%c0_20, %c0_21] : memref<8x128xf32, #tpu.memory_space<vmem>>, vector<8x128xf32>
    tpu.vector_store %arg11[%c0_20, %c0_21], %26 {strides = array<i32>} : memref<8x128xf32, #tpu.memory_space<vmem>>, vector<8x128xf32>,
    return
  }
}

</mosaic_0001>

<bundles_post_ra>
// kernel: _forward.1
= control target key start
LH: loop header
LB: loop body
LE: loop exit
PB: predicated region body
PF: predicated region fallthrough
CT: control target
= control target key end

     0   :  { %17 = vsyncpa [#allocation6], 0  ;;  %s737_s0 = inlined_call_operand.vmem [shape: f32[8,128], index: 0, kind: input, shape index: {}]   ;;  %s738_s1 = inlined_call_operand.hbm [shape: f32[128,128], index: 1, kind: input, shape index: {}]   ;;  %s739_s2 = inlined_call_operand.vmem [shape: f32[1,128], index: 2, kind: input, shape index: {}]   ;;  %s740_s3 = inlined_call_operand.hbm [shape: f32[128,512], index: 3, kind: input, shape index: {}]   ;;  %s741_s4 = inlined_call_operand.vmem [shape: f32[1,512], index: 4, kind: input, shape index: {}]   ;;  %s742_s5 = inlined_call_operand.hbm [shape: f32[512,128], index: 5, kind: input, shape index: {}]   ;;  %s743_s6 = inlined_call_operand.vmem [shape: f32[1,128], index: 6, kind: input, shape index: {}]   ;;  %s744_s7 = inlined_call_operand.vmem [shape: f32[1,128], index: 7, kind: input, shape index: {}]   ;;  %s745_s8 = inlined_call_operand.vmem [shape: f32[1,128], index: 8, kind: input, shape index: {}]   ;;  %s746_s9 = inlined_call_operand.vmem [shape: f32[1,512], index: 9, kind: input, shape index: {}]   ;;  %s747_s10 = inlined_call_operand.hbm [shape: f32[8,512], index: 10, kind: output, shape index: {0}]   ;;  %s748_s11 = inlined_call_operand.hbm [shape: f32[8,128], index: 11, kind: output, shape index: {1}]  }
   0x1   :  { %18 = vsyncpa [#allocation7], 0 }
   0x2   :  { %19 = vsyncpa [#allocation10], 0  ;;  %s26_s19 = sshll.u32 %s738_s1, 4  ;;  %s621_s7 = smov [#allocation5]   ;;  %s27_s19 = int_to_ptr.hbm [resolvable:$true] %s26_s19 }
   0x3   :  { %s28_s20 = sshll.u32 %s621_s7, 4  ;;  %s622_s8 = smov 128   ;;  %s29_s20 = int_to_ptr.vmem [resolvable:$true] %s28_s20 }
   0x4   :  { %s623_s21 = smov 8  }
   0x5   :  { %34 = dma.hbm_to_vmem [thread:$0]  %s27_s19, 2048, %s29_s20, [#allocation6], %s622_s8, %s622_s8, %s623_s21  }
   0x6   :  { %611 = dma.done.wait [#allocation6], 2048  }
   0x7   :  { %612 = vsyncadd [#allocation6], 4294965248  ;;  %v94_v0 = vld [vmem:[#allocation5 + $0x78] sm:$0xff]  ;;  %v93_v1 = vld [vmem:[#allocation5 + $0x70] sm:$0xff]  ;;  %s58_s24 = sshll.u32 %s740_s3, 4  ;;  %s624_s25 = smov [#allocation2]   ;;  %s59_s24 = int_to_ptr.hbm [resolvable:$true] %s58_s24 }
   0x8   :  { %99 = vmatpush.msra.mxu0 %v94_v0  ;;  %v92_v2 = vld [vmem:[#allocation5 + $0x68] sm:$0xff]  ;;  %v91_v3 = vld [vmem:[#allocation5 + $0x60] sm:$0xff]  ;;  %v90_v4 = vld [vmem:[#allocation5 + $0x58] sm:$0xff]  ;;  %s60_s26 = sshll.u32 %s624_s25, 4  ;;  %s72_s29 = sshll.u32 %s742_s5, 4  ;;  %s61_s26 = int_to_ptr.vmem [resolvable:$true] %s60_s26  ;;  %s73_s29 = int_to_ptr.hbm [resolvable:$true] %s72_s29 }
   0x9   :  { %v89_v5 = vld [vmem:[#allocation5 + $0x50] sm:$0xff]  ;;  %v88_v6 = vld [vmem:[#allocation5 + $0x48] sm:$0xff]  ;;  %v87_v7 = vld [vmem:[#allocation5 + $0x40] sm:$0xff]  ;;  %63 = dma.hbm_to_vmem [thread:$0]  %s59_s24, 8192, %s61_s26, [#allocation4] }
   0xa   :  { %100 = vmatpush.msra.mxu0 %v93_v1  ;;  %v86_v8 = vld [vmem:[#allocation5 + $0x38] sm:$0xff]  ;;  %v85_v9 = vld [vmem:[#allocation5 + $0x30] sm:$0xff]  ;;  %v84_v10 = vld [vmem:[#allocation5 + $0x28] sm:$0xff]  ;;  %s625_s30 = smov [#allocation3]  }
   0xb   :  { %v83_v11 = vld [vmem:[#allocation5 + $0x20] sm:$0xff]  ;;  %v82_v12 = vld [vmem:[#allocation5 + $0x18] sm:$0xff]  ;;  %v81_v13 = vld [vmem:[#allocation5 + $0x10] sm:$0xff]  ;;  %s74_s12 = sshll.u32 %s625_s30, 4  ;;  %s75_s12 = int_to_ptr.vmem [resolvable:$true] %s74_s12 }
   0xc   :  { %101 = vmatpush.msra.mxu0 %v92_v2  ;;  %v80_v14 = vld [vmem:[#allocation5 + $0x8] sm:$0xff]  ;;  %v79_v15 = vld [vmem:[#allocation5] sm:$0xff]  ;;  %77 = dma.hbm_to_vmem [thread:$0]  %s73_s29, 8192, %s75_s12, [#allocation4 + $0x1] }
   0xd   :  { %v78_v16 = vld [vmem:[%s737_s0] sm:$0xff] }
   0xe   :  { %102 = vmatpush.msra.mxu0 %v91_v3  ;;  %v489_v17 = vld [vmem:[%s739_s2] ss:$0 sm:$0xff] }
  0x10   :  { %103 = vmatpush.msra.mxu0 %v90_v4 }
  0x12   :  { %104 = vmatpush.msra.mxu0 %v89_v5 }
  0x14   :  { %105 = vmatpush.msra.mxu0 %v88_v6 }
  0x16   :  { %106 = vmatpush.msra.mxu0 %v87_v7 }
  0x18   :  { %107 = vmatpush.msra.mxu0 %v86_v8 }
  0x1a   :  { %108 = vmatpush.msra.mxu0 %v85_v9 }
  0x1c   :  { %109 = vmatpush.msra.mxu0 %v84_v10 }
  0x1e   :  { %110 = vmatpush.msra.mxu0 %v83_v11 }
  0x20   :  { %111 = vmatpush.msra.mxu0 %v82_v12 }
  0x22   :  { %112 = vmatpush.msra.mxu0 %v81_v13 }
  0x24   :  { %113 = vmatpush.msra.mxu0 %v80_v14 }
  0x26   :  { %114 = vmatpush.msra.mxu0 %v79_v15 }
  0x27   :  { %115 = vmatmul.f32.vlgmr.msra.gmra.mxu0 %v78_v16 }
  0xa4   :  { %v116_v18 = vpop.f32.mrf.mxu0 }
  0xa5   :  { %v117_v19 = vadd.f32 %v489_v17, %v116_v18 }
  0xa7   :  { %v703_v20 = vmax.f32 %v117_v19, 0.0 }
  0xa8   :  { %613 = dma.done.wait [#allocation4], 8192 }
  0xa9   :  { %614 = vsyncadd [#allocation4], 4294959104  ;;  %v185_v21 = vld [vmem:[#allocation2 + $0x1e8] sm:$0xff]  ;;  %v186_v22 = vld [vmem:[#allocation2 + $0x1f0] sm:$0xff] }
  0xaa   :  { %v181_v23 = vld [vmem:[#allocation2 + $0x1c8] sm:$0xff]  ;;  %218 = vmatpush.msra.mxu2 %v185_v21  ;;  %238 = vmatpush.msra.mxu3 %v186_v22  ;;  %v182_v24 = vld [vmem:[#allocation2 + $0x1d0] sm:$0xff]  ;;  %v184_v27 = vld [vmem:[#allocation2 + $0x1e0] sm:$0xff] }
  0xab   :  { %v177_v25 = vld [vmem:[#allocation2 + $0x1a8] sm:$0xff]  ;;  %v178_v26 = vld [vmem:[#allocation2 + $0x1b0] sm:$0xff]  ;;  %v187_v28 = vld [vmem:[#allocation2 + $0x1f8] sm:$0xff]  ;;  %198 = vmatpush.msra.mxu1 %v184_v27 }
  0xac   :  { %219 = vmatpush.msra.mxu2 %v181_v23  ;;  %239 = vmatpush.msra.mxu3 %v182_v24  ;;  %v180_v29 = vld [vmem:[#allocation2 + $0x1c0] sm:$0xff]  ;;  %v173_v30 = vld [vmem:[#allocation2 + $0x188] sm:$0xff]  ;;  %v174_v31 = vld [vmem:[#allocation2 + $0x190] sm:$0xff] }
  0xad   :  { %258 = vmatpush.msrb.mxu0 %v187_v28  ;;  %v183_v32 = vld [vmem:[#allocation2 + $0x1d8] sm:$0xff]  ;;  %v176_v33 = vld [vmem:[#allocation2 + $0x1a0] sm:$0xff]  ;;  %199 = vmatpush.msra.mxu1 %v180_v29  ;;  %v169_v35 = vld [vmem:[#allocation2 + $0x168] sm:$0xff] }
  0xae   :  { %220 = vmatpush.msra.mxu2 %v177_v25  ;;  %240 = vmatpush.msra.mxu3 %v178_v26  ;;  %v179_v34 = vld [vmem:[#allocation2 + $0x1b8] sm:$0xff]  ;;  %v170_v36 = vld [vmem:[#allocation2 + $0x170] sm:$0xff]  ;;  %v172_v37 = vld [vmem:[#allocation2 + $0x180] sm:$0xff] }
  0xaf   :  { %259 = vmatpush.msrb.mxu0 %v183_v32  ;;  %v175_v38 = vld [vmem:[#allocation2 + $0x198] sm:$0xff]  ;;  %200 = vmatpush.msra.mxu1 %v176_v33  ;;  %v165_v39 = vld [vmem:[#allocation2 + $0x148] sm:$0xff]  ;;  %v166_v40 = vld [vmem:[#allocation2 + $0x150] sm:$0xff] }
  0xb0   :  { %221 = vmatpush.msra.mxu2 %v173_v30  ;;  %241 = vmatpush.msra.mxu3 %v174_v31  ;;  %v168_v41 = vld [vmem:[#allocation2 + $0x160] sm:$0xff]  ;;  %v171_v42 = vld [vmem:[#allocation2 + $0x178] sm:$0xff]  ;;  %v161_v43 = vld [vmem:[#allocation2 + $0x128] sm:$0xff] }
  0xb1   :  { %260 = vmatpush.msrb.mxu0 %v179_v34  ;;  %201 = vmatpush.msra.mxu1 %v172_v37  ;;  %v162_v44 = vld [vmem:[#allocation2 + $0x130] sm:$0xff]  ;;  %v164_v45 = vld [vmem:[#allocation2 + $0x140] sm:$0xff]  ;;  %v167_v46 = vld [vmem:[#allocation2 + $0x158] sm:$0xff] }
  0xb2   :  { %222 = vmatpush.msra.mxu2 %v169_v35  ;;  %242 = vmatpush.msra.mxu3 %v170_v36  ;;  %v157_v47 = vld [vmem:[#allocation2 + $0x108] sm:$0xff]  ;;  %v158_v48 = vld [vmem:[#allocation2 + $0x110] sm:$0xff]  ;;  %v160_v49 = vld [vmem:[#allocation2 + $0x120] sm:$0xff] }
  0xb3   :  { %261 = vmatpush.msrb.mxu0 %v175_v38  ;;  %202 = vmatpush.msra.mxu1 %v168_v41  ;;  %v163_v50 = vld [vmem:[#allocation2 + $0x138] sm:$0xff]  ;;  %v153_v51 = vld [vmem:[#allocation2 + $0xe8] sm:$0xff]  ;;  %v154_v52 = vld [vmem:[#allocation2 + $0xf0] sm:$0xff] }
  0xb4   :  { %223 = vmatpush.msra.mxu2 %v165_v39  ;;  %243 = vmatpush.msra.mxu3 %v166_v40  ;;  %v156_v53 = vld [vmem:[#allocation2 + $0x100] sm:$0xff]  ;;  %v159_v54 = vld [vmem:[#allocation2 + $0x118] sm:$0xff]  ;;  %v149_v55 = vld [vmem:[#allocation2 + $0xc8] sm:$0xff] }
  0xb5   :  { %262 = vmatpush.msrb.mxu0 %v171_v42  ;;  %203 = vmatpush.msra.mxu1 %v164_v45  ;;  %v150_v56 = vld [vmem:[#allocation2 + $0xd0] sm:$0xff]  ;;  %v152_v57 = vld [vmem:[#allocation2 + $0xe0] sm:$0xff]  ;;  %v155_v58 = vld [vmem:[#allocation2 + $0xf8] sm:$0xff] }
  0xb6   :  { %224 = vmatpush.msra.mxu2 %v161_v43  ;;  %244 = vmatpush.msra.mxu3 %v162_v44  ;;  %v145_v59 = vld [vmem:[#allocation2 + $0xa8] sm:$0xff]  ;;  %v146_v60 = vld [vmem:[#allocation2 + $0xb0] sm:$0xff]  ;;  %v148_v61 = vld [vmem:[#allocation2 + $0xc0] sm:$0xff] }
  0xb7   :  { %263 = vmatpush.msrb.mxu0 %v167_v46  ;;  %204 = vmatpush.msra.mxu1 %v160_v49  ;;  %v151_v62 = vld [vmem:[#allocation2 + $0xd8] sm:$0xff]  ;;  %v141_v63 = vld [vmem:[#allocation2 + $0x88] sm:$0xff]  ;;  %v142_v0 = vld [vmem:[#allocation2 + $0x90] sm:$0xff] }
  0xb8   :  { %225 = vmatpush.msra.mxu2 %v157_v47  ;;  %245 = vmatpush.msra.mxu3 %v158_v48  ;;  %v144_v1 = vld [vmem:[#allocation2 + $0xa0] sm:$0xff]  ;;  %v147_v2 = vld [vmem:[#allocation2 + $0xb8] sm:$0xff]  ;;  %v137_v3 = vld [vmem:[#allocation2 + $0x68] sm:$0xff] }
  0xb9   :  { %264 = vmatpush.msrb.mxu0 %v163_v50  ;;  %205 = vmatpush.msra.mxu1 %v156_v53  ;;  %v138_v4 = vld [vmem:[#allocation2 + $0x70] sm:$0xff]  ;;  %v140_v5 = vld [vmem:[#allocation2 + $0x80] sm:$0xff]  ;;  %v143_v6 = vld [vmem:[#allocation2 + $0x98] sm:$0xff] }
  0xba   :  { %226 = vmatpush.msra.mxu2 %v153_v51  ;;  %246 = vmatpush.msra.mxu3 %v154_v52  ;;  %v133_v7 = vld [vmem:[#allocation2 + $0x48] sm:$0xff]  ;;  %v134_v8 = vld [vmem:[#allocation2 + $0x50] sm:$0xff]  ;;  %v136_v9 = vld [vmem:[#allocation2 + $0x60] sm:$0xff] }
  0xbb   :  { %265 = vmatpush.msrb.mxu0 %v159_v54  ;;  %206 = vmatpush.msra.mxu1 %v152_v57  ;;  %v139_v10 = vld [vmem:[#allocation2 + $0x78] sm:$0xff]  ;;  %v129_v11 = vld [vmem:[#allocation2 + $0x28] sm:$0xff]  ;;  %v130_v12 = vld [vmem:[#allocation2 + $0x30] sm:$0xff] }
  0xbc   :  { %227 = vmatpush.msra.mxu2 %v149_v55  ;;  %247 = vmatpush.msra.mxu3 %v150_v56  ;;  %v132_v13 = vld [vmem:[#allocation2 + $0x40] sm:$0xff]  ;;  %v135_v14 = vld [vmem:[#allocation2 + $0x58] sm:$0xff]  ;;  %v125_v15 = vld [vmem:[#allocation2 + $0x8] sm:$0xff] }
  0xbd   :  { %266 = vmatpush.msrb.mxu0 %v155_v58  ;;  %207 = vmatpush.msra.mxu1 %v148_v61  ;;  %v126_v16 = vld [vmem:[#allocation2 + $0x10] sm:$0xff]  ;;  %v128_v17 = vld [vmem:[#allocation2 + $0x20] sm:$0xff]  ;;  %v131_v18 = vld [vmem:[#allocation2 + $0x38] sm:$0xff] }
  0xbe   :  { %228 = vmatpush.msra.mxu2 %v145_v59  ;;  %248 = vmatpush.msra.mxu3 %v146_v60  ;;  %v124_v19 = vld [vmem:[#allocation2] sm:$0xff]  ;;  %v127_v21 = vld [vmem:[#allocation2 + $0x18] sm:$0xff] }
  0xbf   :  { %267 = vmatpush.msrb.mxu0 %v151_v62  ;;  %208 = vmatpush.msra.mxu1 %v144_v1  ;;  %v188_v22 = vld [vmem:[%s741_s4] sm:$0xf] }
  0xc0   :  { %229 = vmatpush.msra.mxu2 %v141_v63  ;;  %249 = vmatpush.msra.mxu3 %v142_v0  ;;  %v190_v23 = vperm.slane %v188_v22, 0  ;;  %v193_v24 = vperm.slane %v188_v22, 3  ;;  %v191_v25 = vperm.slane %v188_v22, 1  ;;  %v192_v26 = vperm.slane %v188_v22, 2 }
  0xc1   :  { %268 = vmatpush.msrb.mxu0 %v147_v2  ;;  %209 = vmatpush.msra.mxu1 %v140_v5 }
  0xc2   :  { %230 = vmatpush.msra.mxu2 %v137_v3  ;;  %250 = vmatpush.msra.mxu3 %v138_v4 }
  0xc3   :  { %269 = vmatpush.msrb.mxu0 %v143_v6  ;;  %210 = vmatpush.msra.mxu1 %v136_v9 }
  0xc4   :  { %231 = vmatpush.msra.mxu2 %v133_v7  ;;  %251 = vmatpush.msra.mxu3 %v134_v8 }
  0xc5   :  { %270 = vmatpush.msrb.mxu0 %v139_v10  ;;  %211 = vmatpush.msra.mxu1 %v132_v13 }
  0xc6   :  { %232 = vmatpush.msra.mxu2 %v129_v11  ;;  %252 = vmatpush.msra.mxu3 %v130_v12 }
  0xc7   :  { %271 = vmatpush.msrb.mxu0 %v135_v14  ;;  %212 = vmatpush.msra.mxu1 %v128_v17 }
  0xc8   :  { %233 = vmatpush.msra.mxu2 %v125_v15  ;;  %253 = vmatpush.msra.mxu3 %v126_v16 }
  0xc9   :  { %234 = vmatmul.f32.vlgmr.msra.gmra.mxu2 %v703_v20  ;;  %254 = vmatmul.f32.vlgmr.msra.gmra.mxu3 %v703_v20 }
  0xca   :  { %272 = vmatpush.msrb.mxu0 %v131_v18  ;;  %213 = vmatpush.msra.mxu1 %v124_v19 }
  0xcb   :  { %214 = vmatmul.f32.vlgmr.msra.gmra.mxu1 %v703_v20 }
  0xcc   :  { %273 = vmatpush.msrb.mxu0 %v127_v21 }
  0xcd   :  { %274 = vmatmul.f32.vlgmr.msrb.gmra.mxu0 %v703_v20 }
 0x148   :  { %v215_v27 = vpop.f32.mrf.mxu1 }
 0x149   :  { %v712_v29 = vadd.f32 %v215_v27, %v190_v23 }
 0x14a   :  { %v275_v28 = vpop.f32.mrf.mxu0 }
 0x14b   :  { %v714_v30 = vadd.f32 %v275_v28, %v193_v24  ;;  %278 = vst [vmem:[#allocation8] sm:$0xff] %v712_v29 }
 0x14c   :  { %v235_v31 = vpop.f32.mrf.mxu2  ;;  %v255_v32 = vpop.f32.mrf.mxu3 }
 0x14d   :  { %v717_v33 = vadd.f32 %v235_v31, %v191_v25  ;;  %v719_v20 = vadd.f32 %v255_v32, %v192_v26  ;;  %281 = vst [vmem:[#allocation8 + $0x18] sm:$0xff] %v714_v30 }
 0x14f   :  { %279 = vst [vmem:[#allocation8 + $0x8] sm:$0xff] %v717_v33 }
 0x150   :  { %280 = vst [vmem:[#allocation8 + $0x10] sm:$0xff] %v719_v20 }
 0x151   :  { %615 = dma.done.wait [#allocation4 + $0x1], 8192 }
 0x152   :  { %616 = vsyncadd [#allocation4 + $0x1], 4294959104  ;;  %v316_v34 = vld [vmem:[#allocation3 + $0xf8] sm:$0xff]  ;;  %v315_v35 = vld [vmem:[#allocation3 + $0xf0] sm:$0xff]  ;;  %s626_s4 = smov [#allocation8]   ;;  %s441_s16 = sshll.u32 %s747_s10, 4  ;;  %s442_s16 = int_to_ptr.hbm [resolvable:$true] %s441_s16 }
 0x153   :  { %v332_v36 = vld [vmem:[#allocation3 + $0x178] sm:$0xff]  ;;  %373 = vmatpush.msrb.mxu2 %v316_v34  ;;  %v331_v38 = vld [vmem:[#allocation3 + $0x170] sm:$0xff]  ;;  %v314_v39 = vld [vmem:[#allocation3 + $0xe8] sm:$0xff]  ;;  %s439_s5 = sshll.u32 %s626_s4, 4  ;;  %s627_s19 = smov [#allocation9]   ;;  %s440_s5 = int_to_ptr.vmem [resolvable:$true] %s439_s5 }
 0x154   :  { %393 = vmatpush.msrb.mxu3 %v332_v36  ;;  %v300_v37 = vld [vmem:[#allocation3 + $0x78] sm:$0xff]  ;;  %v299_v40 = vld [vmem:[#allocation3 + $0x70] sm:$0xff]  ;;  %v330_v41 = vld [vmem:[#allocation3 + $0x168] sm:$0xff]  ;;  %444 = dma.vmem_to_hbm [thread:$0]  %s440_s5, 512, %s442_s16, [#allocation7]  }
 0x155   :  { %353 = vmatpush.msrb.mxu1 %v300_v37  ;;  %374 = vmatpush.msrb.mxu2 %v315_v35  ;;  %v298_v42 = vld [vmem:[#allocation3 + $0x68] sm:$0xff]  ;;  %v313_v43 = vld [vmem:[#allocation3 + $0xe0] sm:$0xff]  ;;  %v348_v46 = vld [vmem:[#allocation3 + $0x1f8] sm:$0xff]  ;;  %s450_s7 = sshll.u32 %s627_s19, 4  ;;  %s452_s21 = sshll.u32 %s748_s11, 4  ;;  %s451_s7 = int_to_ptr.vmem [resolvable:$true] %s450_s7  ;;  %s453_s21 = int_to_ptr.hbm [resolvable:$true] %s452_s21 }
 0x156   :  { %394 = vmatpush.msrb.mxu3 %v331_v38  ;;  %v329_v44 = vld [vmem:[#allocation3 + $0x160] sm:$0xff]  ;;  %v312_v47 = vld [vmem:[#allocation3 + $0xd8] sm:$0xff]  ;;  %413 = vmatpush.msra.mxu0 %v348_v46  ;;  %v347_v49 = vld [vmem:[#allocation3 + $0x1f0] sm:$0xff] }
 0x157   :  { %354 = vmatpush.msrb.mxu1 %v299_v40  ;;  %375 = vmatpush.msrb.mxu2 %v314_v39  ;;  %v297_v45 = vld [vmem:[#allocation3 + $0x60] sm:$0xff]  ;;  %v328_v48 = vld [vmem:[#allocation3 + $0x158] sm:$0xff]  ;;  %v346_v51 = vld [vmem:[#allocation3 + $0x1e8] sm:$0xff] }
 0x158   :  { %395 = vmatpush.msrb.mxu3 %v330_v41  ;;  %v296_v50 = vld [vmem:[#allocation3 + $0x58] sm:$0xff]  ;;  %v311_v52 = vld [vmem:[#allocation3 + $0xd0] sm:$0xff]  ;;  %414 = vmatpush.msra.mxu0 %v347_v49  ;;  %v345_v55 = vld [vmem:[#allocation3 + $0x1e0] sm:$0xff] }
 0x159   :  { %355 = vmatpush.msrb.mxu1 %v298_v42  ;;  %376 = vmatpush.msrb.mxu2 %v313_v43  ;;  %v327_v53 = vld [vmem:[#allocation3 + $0x150] sm:$0xff]  ;;  %v310_v56 = vld [vmem:[#allocation3 + $0xc8] sm:$0xff]  ;;  %v344_v59 = vld [vmem:[#allocation3 + $0x1d8] sm:$0xff] }
 0x15a   :  { %396 = vmatpush.msrb.mxu3 %v329_v44  ;;  %v295_v54 = vld [vmem:[#allocation3 + $0x50] sm:$0xff]  ;;  %v326_v57 = vld [vmem:[#allocation3 + $0x148] sm:$0xff]  ;;  %415 = vmatpush.msra.mxu0 %v346_v51  ;;  %v309_v60 = vld [vmem:[#allocation3 + $0xc0] sm:$0xff] }
 0x15b   :  { %356 = vmatpush.msrb.mxu1 %v297_v45  ;;  %377 = vmatpush.msrb.mxu2 %v312_v47  ;;  %v294_v58 = vld [vmem:[#allocation3 + $0x48] sm:$0xff]  ;;  %v325_v61 = vld [vmem:[#allocation3 + $0x140] sm:$0xff]  ;;  %v343_v63 = vld [vmem:[#allocation3 + $0x1d0] sm:$0xff] }
 0x15c   :  { %397 = vmatpush.msrb.mxu3 %v328_v48  ;;  %416 = vmatpush.msra.mxu0 %v345_v55  ;;  %v293_v62 = vld [vmem:[#allocation3 + $0x40] sm:$0xff]  ;;  %v308_v0 = vld [vmem:[#allocation3 + $0xb8] sm:$0xff]  ;;  %v342_v3 = vld [vmem:[#allocation3 + $0x1c8] sm:$0xff] }
 0x15d   :  { %357 = vmatpush.msrb.mxu1 %v296_v50  ;;  %378 = vmatpush.msrb.mxu2 %v311_v52  ;;  %v324_v1 = vld [vmem:[#allocation3 + $0x138] sm:$0xff]  ;;  %v307_v4 = vld [vmem:[#allocation3 + $0xb0] sm:$0xff]  ;;  %v341_v7 = vld [vmem:[#allocation3 + $0x1c0] sm:$0xff] }
 0x15e   :  { %398 = vmatpush.msrb.mxu3 %v327_v53  ;;  %417 = vmatpush.msra.mxu0 %v344_v59  ;;  %v292_v2 = vld [vmem:[#allocation3 + $0x38] sm:$0xff]  ;;  %v323_v5 = vld [vmem:[#allocation3 + $0x130] sm:$0xff]  ;;  %v306_v8 = vld [vmem:[#allocation3 + $0xa8] sm:$0xff] }
 0x15f   :  { %358 = vmatpush.msrb.mxu1 %v295_v54  ;;  %379 = vmatpush.msrb.mxu2 %v310_v56  ;;  %v291_v6 = vld [vmem:[#allocation3 + $0x30] sm:$0xff]  ;;  %v322_v9 = vld [vmem:[#allocation3 + $0x128] sm:$0xff]  ;;  %v340_v11 = vld [vmem:[#allocation3 + $0x1b8] sm:$0xff] }
 0x160   :  { %399 = vmatpush.msrb.mxu3 %v326_v57  ;;  %418 = vmatpush.msra.mxu0 %v343_v63  ;;  %v290_v10 = vld [vmem:[#allocation3 + $0x28] sm:$0xff]  ;;  %v305_v12 = vld [vmem:[#allocation3 + $0xa0] sm:$0xff]  ;;  %v339_v15 = vld [vmem:[#allocation3 + $0x1b0] sm:$0xff] }
 0x161   :  { %359 = vmatpush.msrb.mxu1 %v294_v58  ;;  %380 = vmatpush.msrb.mxu2 %v309_v60  ;;  %v321_v13 = vld [vmem:[#allocation3 + $0x120] sm:$0xff]  ;;  %v304_v16 = vld [vmem:[#allocation3 + $0x98] sm:$0xff]  ;;  %v338_v19 = vld [vmem:[#allocation3 + $0x1a8] sm:$0xff] }
 0x162   :  { %400 = vmatpush.msrb.mxu3 %v325_v61  ;;  %419 = vmatpush.msra.mxu0 %v342_v3  ;;  %v289_v14 = vld [vmem:[#allocation3 + $0x20] sm:$0xff]  ;;  %v320_v17 = vld [vmem:[#allocation3 + $0x118] sm:$0xff]  ;;  %v303_v21 = vld [vmem:[#allocation3 + $0x90] sm:$0xff] }
 0x163   :  { %360 = vmatpush.msrb.mxu1 %v293_v62  ;;  %381 = vmatpush.msrb.mxu2 %v308_v0  ;;  %v288_v18 = vld [vmem:[#allocation3 + $0x18] sm:$0xff]  ;;  %v319_v22 = vld [vmem:[#allocation3 + $0x110] sm:$0xff]  ;;  %v337_v24 = vld [vmem:[#allocation3 + $0x1a0] sm:$0xff] }
 0x164   :  { %401 = vmatpush.msrb.mxu3 %v324_v1  ;;  %420 = vmatpush.msra.mxu0 %v341_v7  ;;  %v287_v23 = vld [vmem:[#allocation3 + $0x10] sm:$0xff]  ;;  %v302_v25 = vld [vmem:[#allocation3 + $0x88] sm:$0xff]  ;;  %v336_v28 = vld [vmem:[#allocation3 + $0x198] sm:$0xff] }
 0x165   :  { %361 = vmatpush.msrb.mxu1 %v292_v2  ;;  %382 = vmatpush.msrb.mxu2 %v307_v4  ;;  %v318_v26 = vld [vmem:[#allocation3 + $0x108] sm:$0xff]  ;;  %v301_v31 = vld [vmem:[#allocation3 + $0x80] sm:$0xff]  ;;  %v335_v35 = vld [vmem:[#allocation3 + $0x190] sm:$0xff] }
 0x166   :  { %402 = vmatpush.msrb.mxu3 %v323_v5  ;;  %421 = vmatpush.msra.mxu0 %v340_v11  ;;  %v286_v27 = vld [vmem:[#allocation3 + $0x8] sm:$0xff]  ;;  %v317_v32 = vld [vmem:[#allocation3 + $0x100] sm:$0xff] }
 0x167   :  { %362 = vmatpush.msrb.mxu1 %v291_v6  ;;  %383 = vmatpush.msrb.mxu2 %v306_v8  ;;  %v285_v34 = vld [vmem:[#allocation3] sm:$0xff]  ;;  %v334_v36 = vld [vmem:[#allocation3 + $0x188] sm:$0xff] }
 0x168   :  { %403 = vmatpush.msrb.mxu3 %v322_v9  ;;  %422 = vmatpush.msra.mxu0 %v339_v15  ;;  %v333_v37 = vld [vmem:[#allocation3 + $0x180] sm:$0xff] }
 0x169   :  { %363 = vmatpush.msrb.mxu1 %v290_v10  ;;  %384 = vmatpush.msrb.mxu2 %v305_v12 }
 0x16a   :  { %404 = vmatpush.msrb.mxu3 %v321_v13  ;;  %423 = vmatpush.msra.mxu0 %v338_v19 }
 0x16b   :  { %364 = vmatpush.msrb.mxu1 %v289_v14  ;;  %385 = vmatpush.msrb.mxu2 %v304_v16 }
 0x16c   :  { %405 = vmatpush.msrb.mxu3 %v320_v17  ;;  %424 = vmatpush.msra.mxu0 %v337_v24 }
 0x16d   :  { %365 = vmatpush.msrb.mxu1 %v288_v18  ;;  %386 = vmatpush.msrb.mxu2 %v303_v21 }
 0x16e   :  { %406 = vmatpush.msrb.mxu3 %v319_v22  ;;  %425 = vmatpush.msra.mxu0 %v336_v28 }
 0x16f   :  { %366 = vmatpush.msrb.mxu1 %v287_v23  ;;  %387 = vmatpush.msrb.mxu2 %v302_v25 }
 0x170   :  { %407 = vmatpush.msrb.mxu3 %v318_v26  ;;  %426 = vmatpush.msra.mxu0 %v335_v35 }
 0x171   :  { %367 = vmatpush.msrb.mxu1 %v286_v27  ;;  %388 = vmatpush.msrb.mxu2 %v301_v31 }
 0x172   :  { %408 = vmatpush.msrb.mxu3 %v317_v32  ;;  %389 = vmatmul.f32.vlgmr.msrb.gmra.mxu2 %v717_v33  ;;  %v490_v33 = vld [vmem:[%s743_s6] ss:$0 sm:$0xff] }
 0x173   :  { %409 = vmatmul.f32.vlgmr.msrb.gmra.mxu3 %v719_v20  ;;  %368 = vmatpush.msrb.mxu1 %v285_v34 }
 0x174   :  { %369 = vmatmul.f32.vlgmr.msrb.gmra.mxu1 %v712_v29  ;;  %427 = vmatpush.msra.mxu0 %v334_v36 }
 0x176   :  { %428 = vmatpush.msra.mxu0 %v333_v37 }
 0x177   :  { %429 = vmatmul.f32.vlgmr.msra.gmra.mxu0 %v714_v30 }
 0x1f1   :  { %v370_v20 = vpop.f32.mrf.mxu1 }
 0x1f2   :  { %v371_v29 = vadd.f32 %v490_v33, %v370_v20 }
 0x1f4   :  { %v430_v41 = vpop.f32.mrf.mxu0 }
 0x1f5   :  { %v390_v38 = vpop.f32.mrf.mxu2 }
 0x1f6   :  { %v410_v39 = vpop.f32.mrf.mxu3  ;;  %v391_v40 = vadd.f32 %v390_v38, %v371_v29 }
 0x1f8   :  { %v411_v30 = vadd.f32 %v410_v39, %v391_v40 }
 0x1fa   :  { %v431_v42 = vadd.f32 %v430_v41, %v411_v30 }
 0x1fc   :  { %433 = vst [vmem:[#allocation9] sm:$0xff] %v431_v42 }
 0x1fd   :  { %455 = dma.vmem_to_hbm [thread:$0]  %s451_s7, 128, %s453_s21, [#allocation10]  }
 0x1fe   :  { %617 = dma.done.wait [#allocation7], 512  }
 0x1ff   :  { %618 = vsyncadd [#allocation7], 4294966784 }
 0x200   :  { %619 = dma.done.wait [#allocation10], 128  }
 0x201   :  { %620 = vsyncadd [#allocation10], 4294967168 }
 0x202   :  { %464 = vsyncpa [#allocation6], 1 }
 0x203   :  { %465 = vsyncpa [#allocation7], 1 }
 0x204   :  { %466 = vsyncpa [#allocation10], 1 }
 0x205   :  { %467 = vsyncmov [#allocation4] }
 0x208   :  { %s468_s6 = vpop.sfrf %467 }
 0x209   :  { %p480_p0 = scmp.ne.s32.totalorder %s468_s6, 0 }
 0x20b   :  { %472 = shalt.err (%p480_p0)  }
 0x20c   :  { %474 = vsyncmov [#allocation4 + $0x1] }
 0x20f   :  { %s475_s10 = vpop.sfrf %474 }
 0x210   :  { %p481_p1 = scmp.ne.s32.totalorder %s475_s10, 0 }
 0x212   :  { %479 = shalt.err (%p481_p1)  }

</bundles_post_ra>
